<compile_context>
chip_gen: v6e
topology: v6e:2x2x1
jax: 0.10.0
libtpu: 0.0.40
codegen_flags: <defaults>
</compile_context>

<pallas_src>
import functools

import jax
import jax.numpy as jnp
from jax.experimental import pallas as pl
from jax.experimental.pallas import tpu as pltpu


def _round_up(x, m):
    return (x + m - 1) // m * m


# ----------------------------------------------------------------------------
# Kernel: one batch tile per grid step, weights resident in VMEM.
# ----------------------------------------------------------------------------
def _neumf_kernel(num_fc, l_mlp, *refs):
    # refs layout:
    #   [ue, ie,
    #    w0, b0, ..., w_{L-1}, b_{L-1},
    #    wa_mlp, wa_mf, ba,
    #    out_ref]
    ue_ref, ie_ref = refs[:2]
    fc_refs = refs[2:2 + 2 * num_fc]
    wa_mlp_ref, wa_mf_ref, ba_ref = refs[2 + 2 * num_fc:5 + 2 * num_fc]
    out_ref = refs[-1]

    ue = ue_ref[...]                               # bf16 [TB, l_mlp + l_mf]
    ie = ie_ref[...]                               # bf16 [TB, l_mlp + l_mf]

    # GMF branch: element-wise product on the VPU, in f32 (no bf16 VPU on v5e).
    mf = ue[:, l_mlp:].astype(jnp.float32) * ie[:, l_mlp:].astype(jnp.float32)

    # First MLP layer without materializing the concat:
    #   concat([u_mlp, i_mlp]) @ w0 == u_mlp @ w0[:l_mlp] + i_mlp @ w0[l_mlp:]
    w0 = fc_refs[0][...]                           # bf16 [2*l_mlp, out0]
    b0 = fc_refs[1][...]                           # f32  [1, out0]
    acc = (jnp.dot(ue[:, :l_mlp], w0[:l_mlp, :], preferred_element_type=jnp.float32)
           + jnp.dot(ie[:, :l_mlp], w0[l_mlp:, :], preferred_element_type=jnp.float32)
           + b0)
    acc = jnp.maximum(acc, 0.0)
    x = acc.astype(jnp.bfloat16) if num_fc > 1 else acc

    # Remaining MLP tower: bf16 MXU matmuls, f32 accumulation, ReLU in f32.
    for l in range(1, num_fc):
        w = fc_refs[2 * l][...]                    # bf16 [in, out]
        b = fc_refs[2 * l + 1][...]                # f32  [1, out]
        acc = jnp.dot(x, w, preferred_element_type=jnp.float32) + b
        acc = jnp.maximum(acc, 0.0)
        # keep f32 after the last layer for the VPU epilogue
        x = acc.astype(jnp.bfloat16) if l + 1 < num_fc else acc

    # Split-weight affine epilogue (no concat, no N=1 MXU matmul):
    #   logits = mlp @ wa_mlp + mf @ wa_mf + b   as VPU mul + lane (XLU) reduce.
    logits = (jnp.sum(x * wa_mlp_ref[...], axis=-1, keepdims=True)
              + jnp.sum(mf * wa_mf_ref[...], axis=-1, keepdims=True)
              + ba_ref[...])
    out_ref[...] = jax.nn.sigmoid(logits)


# ----------------------------------------------------------------------------
# Parameter construction (mimics the PyTorch __init__; fused embedding tables,
# split affine weight, bf16 weights / f32 biases).
# ----------------------------------------------------------------------------
def init_neumf_params(key, num_users, num_items, latent_dim_mf, latent_dim_mlp,
                      layers, param_dtype=jnp.bfloat16):
    assert layers[0] == 2 * latent_dim_mlp, "first MLP layer must be 2*latent_dim_mlp"
    n_fc = len(layers) - 1
    keys = jax.random.split(key, 2 + 2 * n_fc + 3)
    k = iter(keys)

    def normal(k_, shape, dtype):
        return (0.01 * jax.random.normal(k_, shape, dtype=jnp.float32)).astype(dtype)

    d_emb = latent_dim_mlp + latent_dim_mf
    params = {
        # fused tables: row = [mlp part (latent_dim_mlp) | mf part (latent_dim_mf)]
        "emb_user": normal(next(k), (num_users, d_emb), param_dtype),
        "emb_item": normal(next(k), (num_items, d_emb), param_dtype),
        "fc": [],
    }
    # fc layers: weight ~ N(0, 0.01), bias ~ U(-1/sqrt(in), 1/sqrt(in)); stored [in, out]
    for in_size, out_size in zip(layers[:-1], layers[1:]):
        w = normal(next(k), (in_size, out_size), param_dtype)
        bound = 1.0 / (in_size ** 0.5)
        b = jax.random.uniform(next(k), (1, out_size), minval=-bound, maxval=bound,
                               dtype=jnp.float32)
        params["fc"].append((w, b))
    aff_in = layers[-1] + latent_dim_mf
    # affine weight split into MLP / MF parts, stored as [1, K] rows (VPU epilogue)
    params["affine_w_mlp"] = normal(next(k), (1, layers[-1]), jnp.float32)
    params["affine_w_mf"] = normal(next(k), (1, latent_dim_mf), jnp.float32)
    bound = 1.0 / (aff_in ** 0.5)
    params["affine_b"] = jax.random.uniform(next(k), (1, 1), minval=-bound,
                                            maxval=bound, dtype=jnp.float32)
    return params


# ----------------------------------------------------------------------------
# Wrapper: embedding gather in XLA, everything else in the kernel.
# ----------------------------------------------------------------------------
def neumf_forward(params, user_indices, item_indices, block_b=2048):
    l_mlp = params["fc"][0][0].shape[0] // 2
    d_emb = params["emb_user"].shape[1]
    l_mf = d_emb - l_mlp
    num_fc = len(params["fc"])

    B = user_indices.shape[0]
    # bf16 activations pack 16 rows per sublane tile -> tiles & padding in 16s.
    tb = min(block_b, _round_up(B, 16))
    tb = max(16, _round_up(tb, 16))
    # Keep >= 2 grid steps where possible so v7x's two TensorCores both get work.
    if _round_up(B, tb) // tb < 2 and tb >= 32:
        tb = _round_up(tb // 2, 16)
    Bp = _round_up(B, tb)
    if Bp != B:
        pad = Bp - B
        user_indices = jnp.concatenate(
            [user_indices, jnp.zeros((pad,), user_indices.dtype)])
        item_indices = jnp.concatenate(
            [item_indices, jnp.zeros((pad,), item_indices.dtype)])

    # Two fused-table gathers; rows go straight into the kernel (no XLA concat
    # or slice pass over the activations).
    # TODO(synk): fuse the gather into the kernel to remove this HBM round trip.
    ue = params["emb_user"][user_indices]          # [Bp, l_mlp + l_mf] bf16
    ie = params["emb_item"][item_indices]          # [Bp, l_mlp + l_mf] bf16

    act_inputs = [ue, ie]
    act_specs = [pl.BlockSpec((tb, d_emb), lambda i: (i, 0)) for _ in act_inputs]

    w_inputs, w_specs = [], []
    for w, b in params["fc"]:
        w_inputs += [w, b]
        w_specs += [pl.BlockSpec(w.shape, lambda i: (0, 0)),
                    pl.BlockSpec(b.shape, lambda i: (0, 0))]
    for name in ("affine_w_mlp", "affine_w_mf", "affine_b"):
        w_inputs.append(params[name])
        w_specs.append(pl.BlockSpec(params[name].shape, lambda i: (0, 0)))

    # Advisory cost estimate so XLA schedules/overlaps the gather around the call.
    fc_flops = sum(2 * w.shape[0] * w.shape[1] for w, _ in params["fc"])
    epi_flops = 2 * (params["fc"][-1][0].shape[1] + l_mf) + l_mf
    weight_bytes = sum(int(a.size) * a.dtype.itemsize for a in w_inputs)
    cost = pl.CostEstimate(
        flops=int(Bp * (fc_flops + epi_flops)),
        transcendentals=int(Bp),
        bytes_accessed=int(ue.size * ue.dtype.itemsize
                           + ie.size * ie.dtype.itemsize
                           + Bp * 4 + weight_bytes))

    kernel = functools.partial(_neumf_kernel, num_fc, l_mlp)
    out = pl.pallas_call(
        kernel,
        out_shape=jax.ShapeDtypeStruct((Bp, 1), jnp.float32),
        grid=(Bp // tb,),
        in_specs=act_specs + w_specs,
        out_specs=pl.BlockSpec((tb, 1), lambda i: (i, 0)),
        compiler_params=pltpu.CompilerParams(
            dimension_semantics=("parallel",),
            vmem_limit_bytes=32 * 1024 * 1024),
        cost_estimate=cost,
    )(*(act_inputs + w_inputs))
    return out[:B]


# Pure-JAX reference mirroring the same numerics (bf16 weights, f32 accum,
# split first-layer weight and split affine epilogue).
def neumf_reference(params, user_indices, item_indices):
    l_mlp = params["fc"][0][0].shape[0] // 2
    n_fc = len(params["fc"])
    ue = params["emb_user"][user_indices]
    ie = params["emb_item"][item_indices]
    mf = ue[:, l_mlp:].astype(jnp.float32) * ie[:, l_mlp:].astype(jnp.float32)
    w0, b0 = params["fc"][0]
    acc = (jnp.dot(ue[:, :l_mlp], w0[:l_mlp, :], preferred_element_type=jnp.float32)
           + jnp.dot(ie[:, :l_mlp], w0[l_mlp:, :], preferred_element_type=jnp.float32)
           + b0)
    acc = jnp.maximum(acc, 0.0)
    x = acc.astype(jnp.bfloat16) if n_fc > 1 else acc
    for l in range(1, n_fc):
        w, b = params["fc"][l]
        acc = jnp.maximum(jnp.dot(x, w, preferred_element_type=jnp.float32) + b, 0.0)
        x = acc.astype(jnp.bfloat16) if l + 1 < n_fc else acc
    logits = (jnp.sum(x * params["affine_w_mlp"], axis=-1, keepdims=True)
              + jnp.sum(mf * params["affine_w_mf"], axis=-1, keepdims=True)
              + params["affine_b"])
    return jax.nn.sigmoid(logits)


if __name__ == "__main__":
    # Small, deterministic config consistent with the module.
    num_users, num_items = 64, 96
    latent_dim_mf, latent_dim_mlp = 8, 8
    layers = [16, 32, 16, 8]            # layers[0] == 2 * latent_dim_mlp
    batch = 24

    key = jax.random.PRNGKey(0)
    k_params, k_u, k_i = jax.random.split(key, 3)
    params = init_neumf_params(k_params, num_users, num_items,
                               latent_dim_mf, latent_dim_mlp, layers)

    user_indices = jax.random.randint(k_u, (batch,), 0, num_users, dtype=jnp.int32)
    item_indices = jax.random.randint(k_i, (batch,), 0, num_items, dtype=jnp.int32)

    fwd = jax.jit(neumf_forward, static_argnames=("block_b",))
    # The small test batch (24) is padded to 32 and split into two 16-row tiles,
    # so the multi-step batch grid path is exercised; production uses block_b=2048.
    rating = fwd(params, user_indices, item_indices)
    rating = jax.block_until_ready(rating)

    ref = neumf_reference(params, user_indices, item_indices)
    assert rating.shape == (batch, 1)
    assert jnp.allclose(rating, ref, atol=2e-3, rtol=0), "mismatch vs reference"

    print("KERNEL_OK")
</pallas_src>

<mosaic_0001>
module attributes {stable_mosaic.version = 11 : i64} {
  func.func @_neumf_kernel(%arg0: i32, %arg1: memref<16x16xbf16, #tpu.memory_space<vmem>>, %arg2: memref<16x16xbf16, #tpu.memory_space<vmem>>, %arg3: memref<16x32xbf16, #tpu.memory_space<vmem>>, %arg4: memref<1x32xf32, #tpu.memory_space<vmem>>, %arg5: memref<32x16xbf16, #tpu.memory_space<vmem>>, %arg6: memref<1x16xf32, #tpu.memory_space<vmem>>, %arg7: memref<16x8xbf16, #tpu.memory_space<vmem>>, %arg8: memref<1x8xf32, #tpu.memory_space<vmem>>, %arg9: memref<1x8xf32, #tpu.memory_space<vmem>>, %arg10: memref<1x8xf32, #tpu.memory_space<vmem>>, %arg11: memref<1x1xf32, #tpu.memory_space<vmem>>, %arg12: memref<16x1xf32, #tpu.memory_space<vmem>>) attributes {dimension_semantics = [#tpu.dimension_semantics<parallel>], iteration_bounds = array<i64: 2>, scalar_prefetch = 0 : i64, scratch_operands = 0 : i64, tpu.core_type = #tpu.core_type<tc>, window_params = [{transform_indices = @transform_0, window_bounds = array<i64: 16, 16>}, {transform_indices = @transform_1, window_bounds = array<i64: 16, 16>}, {pipeline_mode = #tpu.pipeline_mode<synchronous>, transform_indices = @transform_2, window_bounds = array<i64: 16, 32>}, {pipeline_mode = #tpu.pipeline_mode<synchronous>, transform_indices = @transform_3, window_bounds = array<i64: 1, 32>}, {pipeline_mode = #tpu.pipeline_mode<synchronous>, transform_indices = @transform_4, window_bounds = array<i64: 32, 16>}, {pipeline_mode = #tpu.pipeline_mode<synchronous>, transform_indices = @transform_5, window_bounds = array<i64: 1, 16>}, {pipeline_mode = #tpu.pipeline_mode<synchronous>, transform_indices = @transform_6, window_bounds = array<i64: 16, 8>}, {pipeline_mode = #tpu.pipeline_mode<synchronous>, transform_indices = @transform_7, window_bounds = array<i64: 1, 8>}, {pipeline_mode = #tpu.pipeline_mode<synchronous>, transform_indices = @transform_8, window_bounds = array<i64: 1, 8>}, {pipeline_mode = #tpu.pipeline_mode<synchronous>, transform_indices = @transform_9, window_bounds = array<i64: 1, 8>}, {pipeline_mode = #tpu.pipeline_mode<synchronous>, transform_indices = @transform_10, window_bounds = array<i64: 1, 1>}, {transform_indices = @transform_11, window_bounds = array<i64: 16, 1>}]} {
    %c0 = arith.constant 0 : index
    %c0_0 = arith.constant 0 : index
    %0 = vector.load %arg1[%c0, %c0_0] : memref<16x16xbf16, #tpu.memory_space<vmem>>, vector<16x16xbf16>
    %c0_1 = arith.constant 0 : index
    %c0_2 = arith.constant 0 : index
    %1 = vector.load %arg2[%c0_1, %c0_2] : memref<16x16xbf16, #tpu.memory_space<vmem>>, vector<16x16xbf16>
    %2 = vector.extract_strided_slice %0 {offsets = [0, 8], sizes = [16, 8], strides = [1, 1]} : vector<16x16xbf16> to vector<16x8xbf16>
    %3 = arith.extf %2 : vector<16x8xbf16> to vector<16x8xf32>
    %4 = vector.extract_strided_slice %1 {offsets = [0, 8], sizes = [16, 8], strides = [1, 1]} : vector<16x16xbf16> to vector<16x8xbf16>
    %5 = arith.extf %4 : vector<16x8xbf16> to vector<16x8xf32>
    %6 = arith.mulf %3, %5 : vector<16x8xf32>
    %c0_3 = arith.constant 0 : index
    %c0_4 = arith.constant 0 : index
    %7 = vector.load %arg3[%c0_3, %c0_4] : memref<16x32xbf16, #tpu.memory_space<vmem>>, vector<16x32xbf16>
    %c0_5 = arith.constant 0 : index
    %c0_6 = arith.constant 0 : index
    %8 = vector.load %arg4[%c0_5, %c0_6] : memref<1x32xf32, #tpu.memory_space<vmem>>, vector<1x32xf32>
    %9 = vector.extract_strided_slice %0 {offsets = [0, 0], sizes = [16, 8], strides = [1, 1]} : vector<16x16xbf16> to vector<16x8xbf16>
    %10 = vector.extract_strided_slice %7 {offsets = [0, 0], sizes = [8, 32], strides = [1, 1]} : vector<16x32xbf16> to vector<8x32xbf16>
    %cst = arith.constant dense<0.000000e+00> : vector<16x32xf32>
    %11 = tpu.matmul %9, %10, %cst {dimension_numbers = #tpu.dot_dimension_numbers<[1], [0], [0], [1], [0, 0, 1, 1], [], []>} : vector<16x8xbf16>, vector<8x32xbf16>, vector<16x32xf32> -> vector<16x32xf32>
    %12 = vector.extract_strided_slice %1 {offsets = [0, 0], sizes = [16, 8], strides = [1, 1]} : vector<16x16xbf16> to vector<16x8xbf16>
    %13 = vector.extract_strided_slice %7 {offsets = [8, 0], sizes = [8, 32], strides = [1, 1]} : vector<16x32xbf16> to vector<8x32xbf16>
    %cst_7 = arith.constant dense<0.000000e+00> : vector<16x32xf32>
    %14 = tpu.matmul %12, %13, %cst_7 {dimension_numbers = #tpu.dot_dimension_numbers<[1], [0], [0], [1], [0, 0, 1, 1], [], []>} : vector<16x8xbf16>, vector<8x32xbf16>, vector<16x32xf32> -> vector<16x32xf32>
    %15 = arith.addf %11, %14 : vector<16x32xf32>
    %16 = vector.broadcast %8 : vector<1x32xf32> to vector<16x32xf32>
    %17 = arith.addf %15, %16 : vector<16x32xf32>
    %cst_8 = arith.constant 0.000000e+00 : f32
    %18 = vector.broadcast %cst_8 : f32 to vector<16x32xf32>
    %19 = arith.maximumf %17, %18 : vector<16x32xf32>
    %20 = arith.truncf %19 : vector<16x32xf32> to vector<16x32xbf16>
    %c0_9 = arith.constant 0 : index
    %c0_10 = arith.constant 0 : index
    %21 = vector.load %arg5[%c0_9, %c0_10] : memref<32x16xbf16, #tpu.memory_space<vmem>>, vector<32x16xbf16>
    %c0_11 = arith.constant 0 : index
    %c0_12 = arith.constant 0 : index
    %22 = vector.load %arg6[%c0_11, %c0_12] : memref<1x16xf32, #tpu.memory_space<vmem>>, vector<1x16xf32>
    %cst_13 = arith.constant dense<0.000000e+00> : vector<16x16xf32>
    %23 = tpu.matmul %20, %21, %cst_13 {dimension_numbers = #tpu.dot_dimension_numbers<[1], [0], [0], [1], [0, 0, 1, 1], [], []>} : vector<16x32xbf16>, vector<32x16xbf16>, vector<16x16xf32> -> vector<16x16xf32>
    %24 = vector.broadcast %22 : vector<1x16xf32> to vector<16x16xf32>
    %25 = arith.addf %23, %24 : vector<16x16xf32>
    %cst_14 = arith.constant 0.000000e+00 : f32
    %26 = vector.broadcast %cst_14 : f32 to vector<16x16xf32>
    %27 = arith.maximumf %25, %26 : vector<16x16xf32>
    %28 = arith.truncf %27 : vector<16x16xf32> to vector<16x16xbf16>
    %c0_15 = arith.constant 0 : index
    %c0_16 = arith.constant 0 : index
    %29 = vector.load %arg7[%c0_15, %c0_16] : memref<16x8xbf16, #tpu.memory_space<vmem>>, vector<16x8xbf16>
    %c0_17 = arith.constant 0 : index
    %c0_18 = arith.constant 0 : index
    %30 = vector.load %arg8[%c0_17, %c0_18] : memref<1x8xf32, #tpu.memory_space<vmem>>, vector<1x8xf32>
    %cst_19 = arith.constant dense<0.000000e+00> : vector<16x8xf32>
    %31 = tpu.matmul %28, %29, %cst_19 {dimension_numbers = #tpu.dot_dimension_numbers<[1], [0], [0], [1], [0, 0, 1, 1], [], []>} : vector<16x16xbf16>, vector<16x8xbf16>, vector<16x8xf32> -> vector<16x8xf32>
    %32 = vector.broadcast %30 : vector<1x8xf32> to vector<16x8xf32>
    %33 = arith.addf %31, %32 : vector<16x8xf32>
    %cst_20 = arith.constant 0.000000e+00 : f32
    %34 = vector.broadcast %cst_20 : f32 to vector<16x8xf32>
    %35 = arith.maximumf %33, %34 : vector<16x8xf32>
    %c0_21 = arith.constant 0 : index
    %c0_22 = arith.constant 0 : index
    %36 = vector.load %arg9[%c0_21, %c0_22] : memref<1x8xf32, #tpu.memory_space<vmem>>, vector<1x8xf32>
    %37 = vector.broadcast %36 : vector<1x8xf32> to vector<16x8xf32>
    %38 = arith.mulf %35, %37 : vector<16x8xf32>
    %cst_23 = arith.constant dense<0.000000e+00> : vector<16xf32>
    %39 = vector.multi_reduction <add>, %38, %cst_23 [1] : vector<16x8xf32> to vector<16xf32>
    %40 = vector.shape_cast %39 : vector<16xf32> to vector<16x1xf32>
    %c0_24 = arith.constant 0 : index
    %c0_25 = arith.constant 0 : index
    %41 = vector.load %arg10[%c0_24, %c0_25] : memref<1x8xf32, #tpu.memory_space<vmem>>, vector<1x8xf32>
    %42 = vector.broadcast %41 : vector<1x8xf32> to vector<16x8xf32>
    %43 = arith.mulf %6, %42 : vector<16x8xf32>
    %cst_26 = arith.constant dense<0.000000e+00> : vector<16xf32>
    %44 = vector.multi_reduction <add>, %43, %cst_26 [1] : vector<16x8xf32> to vector<16xf32>
    %45 = vector.shape_cast %44 : vector<16xf32> to vector<16x1xf32>
    %46 = arith.addf %40, %45 : vector<16x1xf32>
    %c0_27 = arith.constant 0 : index
    %c0_28 = arith.constant 0 : index
    %47 = vector.load %arg11[%c0_27, %c0_28] : memref<1x1xf32, #tpu.memory_space<vmem>>, vector<1x1xf32>
    %48 = vector.broadcast %47 : vector<1x1xf32> to vector<16x1xf32>
    %49 = arith.addf %46, %48 : vector<16x1xf32>
    %50 = arith.negf %49 : vector<16x1xf32>
    %51 = math.exp %50 : vector<16x1xf32>
    %cst_29 = arith.constant 1.000000e+00 : f32
    %52 = vector.broadcast %cst_29 : f32 to vector<16x1xf32>
    %53 = arith.addf %52, %51 : vector<16x1xf32>
    %54 = arith.divf %52, %53 : vector<16x1xf32>
    %c0_30 = arith.constant 0 : index
    %c0_31 = arith.constant 0 : index
    %55 = vector.load %arg12[%c0_30, %c0_31] : memref<16x1xf32, #tpu.memory_space<vmem>>, vector<16x1xf32>
    tpu.vector_store %arg12[%c0_30, %c0_31], %54 {strides = array<i32>} : memref<16x1xf32, #tpu.memory_space<vmem>>, vector<16x1xf32>,
    return
  }
  func.func @transform_0(%arg0: i32) -> (i32, i32) {
    %c0_i32 = arith.constant 0 : i32
    %c0_i32_0 = arith.constant 0 : i32
    return %arg0, %c0_i32 : i32, i32
  }
  func.func @transform_1(%arg0: i32) -> (i32, i32) {
    %c0_i32 = arith.constant 0 : i32
    %c0_i32_0 = arith.constant 0 : i32
    return %arg0, %c0_i32 : i32, i32
  }
  func.func @transform_2(%arg0: i32) -> (i32, i32) {
    %c0_i32 = arith.constant 0 : i32
    %c0_i32_0 = arith.constant 0 : i32
    %c0_i32_1 = arith.constant 0 : i32
    return %c0_i32, %c0_i32_0 : i32, i32
  }
  func.func @transform_3(%arg0: i32) -> (i32, i32) {
    %c0_i32 = arith.constant 0 : i32
    %c0_i32_0 = arith.constant 0 : i32
    %c0_i32_1 = arith.constant 0 : i32
    return %c0_i32, %c0_i32_0 : i32, i32
  }
  func.func @transform_4(%arg0: i32) -> (i32, i32) {
    %c0_i32 = arith.constant 0 : i32
    %c0_i32_0 = arith.constant 0 : i32
    %c0_i32_1 = arith.constant 0 : i32
    return %c0_i32, %c0_i32_0 : i32, i32
  }
  func.func @transform_5(%arg0: i32) -> (i32, i32) {
    %c0_i32 = arith.constant 0 : i32
    %c0_i32_0 = arith.constant 0 : i32
    %c0_i32_1 = arith.constant 0 : i32
    return %c0_i32, %c0_i32_0 : i32, i32
  }
  func.func @transform_6(%arg0: i32) -> (i32, i32) {
    %c0_i32 = arith.constant 0 : i32
    %c0_i32_0 = arith.constant 0 : i32
    %c0_i32_1 = arith.constant 0 : i32
    return %c0_i32, %c0_i32_0 : i32, i32
  }
  func.func @transform_7(%arg0: i32) -> (i32, i32) {
    %c0_i32 = arith.constant 0 : i32
    %c0_i32_0 = arith.constant 0 : i32
    %c0_i32_1 = arith.constant 0 : i32
    return %c0_i32, %c0_i32_0 : i32, i32
  }
  func.func @transform_8(%arg0: i32) -> (i32, i32) {
    %c0_i32 = arith.constant 0 : i32
    %c0_i32_0 = arith.constant 0 : i32
    %c0_i32_1 = arith.constant 0 : i32
    return %c0_i32, %c0_i32_0 : i32, i32
  }
  func.func @transform_9(%arg0: i32) -> (i32, i32) {
    %c0_i32 = arith.constant 0 : i32
    %c0_i32_0 = arith.constant 0 : i32
    %c0_i32_1 = arith.constant 0 : i32
    return %c0_i32, %c0_i32_0 : i32, i32
  }
  func.func @transform_10(%arg0: i32) -> (i32, i32) {
    %c0_i32 = arith.constant 0 : i32
    %c0_i32_0 = arith.constant 0 : i32
    %c0_i32_1 = arith.constant 0 : i32
    return %c0_i32, %c0_i32_0 : i32, i32
  }
  func.func @transform_11(%arg0: i32) -> (i32, i32) {
    %c0_i32 = arith.constant 0 : i32
    %c0_i32_0 = arith.constant 0 : i32
    return %arg0, %c0_i32 : i32, i32
  }
}

</mosaic_0001>

<bundles_post_ra>
// kernel: neumf_forward.1
= control target key start
LH: loop header
LB: loop body
LE: loop exit
PB: predicated region body
PF: predicated region fallthrough
CT: control target
= control target key end

     0   :  { %s979_s19 = smov 0   ;;  %s1039_s0 = inlined_call_operand.vmem [shape: bf16[32,16], index: 0, kind: input, shape index: {}]   ;;  %s1040_s1 = inlined_call_operand.vmem [shape: bf16[32,16], index: 1, kind: input, shape index: {}]   ;;  %s1041_s2 = inlined_call_operand.vmem [shape: bf16[16,32], index: 2, kind: input, shape index: {}]   ;;  %s1042_s3 = inlined_call_operand.vmem [shape: f32[1,32], index: 3, kind: input, shape index: {}]   ;;  %s1043_s4 = inlined_call_operand.vmem [shape: bf16[32,16], index: 4, kind: input, shape index: {}]   ;;  %s1044_s5 = inlined_call_operand.vmem [shape: f32[1,16], index: 5, kind: input, shape index: {}]   ;;  %s1045_s6 = inlined_call_operand.vmem [shape: bf16[16,8], index: 6, kind: input, shape index: {}]   ;;  %s1046_s7 = inlined_call_operand.vmem [shape: f32[1,8], index: 7, kind: input, shape index: {}]   ;;  %s1047_s8 = inlined_call_operand.vmem [shape: f32[1,8], index: 8, kind: input, shape index: {}]   ;;  %s1048_s9 = inlined_call_operand.vmem [shape: f32[1,8], index: 9, kind: input, shape index: {}]   ;;  %s1049_s10 = inlined_call_operand.<no memory space> [shape: f32[1,1], index: 10, kind: input, shape index: {}]   ;;  %s1050_s11 = inlined_call_operand.vmem [shape: f32[32,1], index: 11, kind: output, shape index: {}]  }
   0x1   :  { %v16_v0 = vstv %s1049_s10 }
   0x2   :  { %17 = vst [vmem:[#allocation2] sm:$0x1] %v16_v0 }
   0x3 LB: > { %s812_s20 = sadd.s32 4294967295, %s910_s19   ;;  %p816_p0 = scmp.ge.s32.totalorder %s910_s19, 1  ;;  %s910_s19 = sphi %s979_s19, %s23_s19  }
   0x4   : > { %p351_p1 = scmp.lt.s32.totalorder %s910_s19, 3 }
   0x6   : > { %p352_p2 = pnand %p816_p0, %p351_p1 }
   0x7   : > { %s817_s24 = sshll.u32 (!%p352_p2), %s812_s20, 1  ;;  %s914_s20 = smov (!%p352_p2), 8  }
   0x8   : > { %355 = sbr.rel (%p352_p2) target bundleno = 806 (0x326), region = 64  ;;  %p397_p3 = scmp.lt.s32.totalorder (!%p352_p2), %s817_s24, 3 }
   0xd   : > { %v426_v1 = vld [vmem:[%s1041_s2 + $0x4] sm:$0xf]  ;;  %vm437_vm0 = vcmask 1043456   ;;  %v425_v2 = vld [vmem:[%s1041_s2] sm:$0xf]  ;;  %v912_v3 = vmov 0.0  }
   0xe   : > { %851 = vmatprep.subr.bf16.mxu0 %v912_v3  ;;  %857 = vmatprep.subr.bf16.mxu1 %v912_v3  ;;  %v439_v4 = vsel %vm437_vm0, %v426_v1, 0  ;;  %v491_v5 = vsel %vm437_vm0, %v425_v2, 0  ;;  %vm913_vm1 = vmmov 0   ;;  %s1052_s24 = smov (!%p397_p3, %s817_s24), 3  ;;  %vm433_vm2 = vcmask 64512   ;;  %v891_v8 = vld [vmem:[%s1043_s4 + $0x8] sm:$0xff]  }
   0xf   : > { %852 = vmatpush3.bf16.msra.mxu0 %v439_v4  ;;  %858 = vmatpush3.bf16.msra.mxu1 %v491_v5  ;;  %s818_s25 = sshll.u32 %s1052_s24, 2  ;;  %v892_v9 = vld [vmem:[%s1043_s4] sm:$0xff]   ;;  %vm568_vm3 = vcmask 261120   ;;  %vm631_vm4 = vcmask 130048   ;;  %s822_s13 = sshll.u32 %s1052_s24, 3  ;;  %vm741_vm5 = vcmask 7168  }
  0x10   : > { %853 = vmatprep.mubr.msk.bf16.mxu0 %vm913_vm1, %v912_v3  ;;  %859 = vmatprep.mubr.msk.bf16.mxu1 %vm913_vm1, %v912_v3  ;;  %s406_s28 = scalar_lea.vmem %s1040_s1, %s818_s25  ;;  %s400_s12 = scalar_lea.vmem %s1039_s0, %s818_s25  ;;  %v836_v10 = vld [vmem:[%s1048_s9] ss:$0 sm:$0xff] }
  0x11   : > { %863 = vmatprep.subr.bf16.mxu0 %v912_v3  ;;  %871 = vmatprep.subr.bf16.mxu1 %v912_v3  ;;  %v417_v6 = vld [vmem:[%s406_s28] sm:$0xff]   ;;  %s915_s25 = smov 120   ;;  %s412_s16 = scalar_lea.vmem %s1050_s11, %s822_s13 }
  0x12   : > { %v415_v7 = vld [vmem:[%s400_s12] sm:$0xff]   ;;  %854 = vmatmul.mubr.msk.bf16.vlgmr.msra.gmra.mxu0 %vm433_vm2, %v417_v6  ;;  %699 = vrot.lane.b32.xlu0 %v836_v10, %s914_s20  ;;  %v421_v29 = vunpack.c.l.bf16 %v417_v6  ;;  %v422_v31 = vunpack.c.h.bf16 %v417_v6 }
  0x13   : > { %860 = vmatmul.mubr.msk.bf16.vlgmr.msra.gmra.mxu1 %vm433_vm2, %v415_v7  ;;  %867 = vmatprep.mubr.msk.bf16.mxu0 %vm913_vm1, %v912_v3  ;;  %v827_v15 = vld [vmem:[%s1042_s3] ss:$0 sm:$0xff]  ;;  %v419_v28 = vunpack.c.l.bf16 %v415_v7  ;;  %v420_v30 = vunpack.c.h.bf16 %v415_v7 }
  0x14   : > { %873 = vmatprep.mubr.msk.bf16.mxu1 %vm913_vm1, %v912_v3  ;;  %864 = vmatpush3.bf16.msra.mxu0 %v891_v8  ;;  %v893_v27 = vld [vmem:[%s1045_s6] sm:$0xff]  }
  0x15   : > { %865 = vmatprep.subr.bf16.mxu0 %v912_v3  ;;  %872 = vmatpush3.bf16.msra.mxu1 %v893_v27  ;;  %v423_v33 = vmul.f32 %v421_v29, %v419_v28  ;;  %v424_v34 = vmul.f32 %v422_v31, %v420_v30  ;;  %v828_v37 = vld [vmem:[%s1044_s5] ss:$0 sm:$0xff] }
  0x16   : > { %v832_v49 = vld [vmem:[%s1046_s7] ss:$0 sm:$0xff] }
  0x17   : > { %v835_v53 = vld [vmem:[%s1047_s8] ss:$0 sm:$0xff] }
  0x18   : > { %866 = vmatpush3.bf16.msra.mxu0 %v892_v9  ;;  %v837_v3 = vld [vmem:[#allocation2] ss:$0 sm:$0xff] }
  0x84   : > { %v700_v32 = vpop.permute.xlu0 %699 }
  0x85   : > { %v702_v35 = vmul.f32 %v700_v32, %v423_v33  ;;  %v703_v36 = vmul.f32 %v700_v32, %v424_v34 }
  0x87   : > { %708 = vrot.lane.b32.xlu1 %v703_v36, %s915_s25  ;;  %706 = vrot.lane.b32.xlu0 %v702_v35, %s915_s25 }
  0xd2   : > { %v475_v11 = vpop.f32.mrf.mxu0 }
  0xd3   : > { %v527_v12 = vpop.f32.mrf.mxu1 }
  0xd4   : > { %v528_v13 = vadd.f32 %v527_v12, %v475_v11  ;;  %v855_v14 = vpop.f32.mrf.mxu0 }
  0xd5   : > { %v861_v16 = vpop.f32.mrf.mxu1 }
  0xd6   : > { %v478_v17 = vpop.f32.mrf.mxu0  ;;  %v540_v19 = vadd.f32 %v827_v15, %v528_v13 }
  0xd7   : > { %v530_v18 = vpop.f32.mrf.mxu1 }
  0xd8   : > { %v531_v20 = vadd.f32 %v530_v18, %v478_v17  ;;  %v856_v21 = vpop.f32.mrf.mxu0  ;;  %v542_v24 = vmax.f32 %v540_v19, 0.0 }
  0xd9   : > { %v862_v22 = vpop.f32.mrf.mxu1 }
  0xda   : > { %v541_v23 = vadd.f32 %v827_v15, %v531_v20 }
  0xdc   : > { %v543_v25 = vmax.f32 %v541_v23, 0.0 }
  0xde   : > { %v544_v26 = vpack.c.bf16 %v543_v25, %v542_v24 }
  0xe0   : > { %868 = vmatmul.mubr.msk.bf16.vlgmr.msra.gmra.mxu0 %vm568_vm3, %v544_v26 }
  0xf9   : > { %v707_v47 = vpop.permute.xlu0 %706  ;;  %v709_v61 = vpop.permute.xlu1 %708 }
  0xfa   : > { %v712_v48 = vsel %vm433_vm2, %v707_v47, 0.0  ;;  %v715_v63 = vsel %vm433_vm2, %v709_v61, 0.0 }
  0xfb   : > { %713 = vadd.xlane.f32.xlu0 %v712_v48 }
 0x184   : > { %v714_v1 = vpop.xlane.xlu0 %713 }
 0x1a0   : > { %v606_v38 = vpop.f32.mrf.mxu0 }
 0x1a1   : > { %v607_v40 = vadd.f32 %v828_v37, %v606_v38 }
 0x1a2   : > { %v869_v39 = vpop.f32.mrf.mxu0 }
 0x1a3   : > { %v613_v44 = vmax.f32 %v607_v40, 0.0 }
 0x1a4   : > { %v609_v41 = vpop.f32.mrf.mxu0 }
 0x1a5   : > { %v610_v42 = vadd.f32 %v828_v37, %v609_v41 }
 0x1a6   : > { %v870_v43 = vpop.f32.mrf.mxu0 }
 0x1a7   : > { %v614_v45 = vmax.f32 %v610_v42, 0.0 }
 0x1a9   : > { %v615_v46 = vpack.c.bf16 %v614_v45, %v613_v44 }
 0x1ab   : > { %874 = vmatmul.mubr.msk.bf16.vlgmr.msra.gmra.mxu1 %vm631_vm4, %v615_v46 }
 0x26b   : > { %v669_v50 = vpop.f32.mrf.mxu1 }
 0x26c   : > { %v670_v51 = vadd.f32 %v832_v49, %v669_v50 }
 0x26d   : > { %v875_v52 = vpop.f32.mrf.mxu1 }
 0x26e   : > { %v676_v54 = vmax.f32 %v670_v51, 0.0 }
 0x26f   : > { %v672_v55 = vpop.f32.mrf.mxu1 }
 0x270   : > { %v673_v56 = vadd.f32 %v832_v49, %v672_v55  ;;  %v685_v57 = vmul.f32 %v835_v53, %v676_v54 }
 0x271   : > { %v876_v58 = vpop.f32.mrf.mxu1 }
 0x272   : > { %v677_v59 = vmax.f32 %v673_v56, 0.0  ;;  %v687_v60 = vsel %vm433_vm2, %v685_v57, 0.0 }
 0x273   : > { %688 = vadd.xlane.f32.xlu1 %v687_v60 }
 0x274   : > { %v686_v62 = vmul.f32 %v835_v53, %v677_v59 }
 0x276   : > { %v690_v0 = vsel %vm433_vm2, %v686_v62, 0.0 }
 0x277   : > { %716 = vadd.xlane.f32.xlu1 %v715_v63  ;;  %691 = vadd.xlane.f32.xlu0 %v690_v0 }
 0x2fc   : > { %v689_v2 = vpop.xlane.xlu1 %688 }
 0x2fd   : > { %v718_v4 = vadd.f32 %v714_v1, %v689_v2 }
 0x2ff   : > { %v727_v5 = vadd.f32 %v837_v3, %v718_v4 }
 0x300   : > { %v717_v6 = vpop.xlane.xlu1 %716  ;;  %v692_v7 = vpop.xlane.xlu0 %691 }
 0x301   : > { %v838_v8 = vmul.f32 -1.442695, %v727_v5  ;;  %v719_v9 = vadd.f32 %v717_v6, %v692_v7 }
 0x303   : > { %896 = vpow2.f32 %v838_v8  ;;  %v728_v10 = vadd.f32 %v837_v3, %v719_v9 }
 0x305   : > { %v839_v11 = vmul.f32 -1.442695, %v728_v10 }
 0x307   : > { %898 = vpow2.f32 %v839_v11 }
 0x310   : > { %v897_v12 = vpop.eup %896 }
 0x311   : > { %v735_v13 = vadd.f32 1.0, %v897_v12 }
 0x313   : > { %900 = vrcp.f32 %v735_v13 }
 0x314   : > { %v899_v14 = vpop.eup %898 }
 0x315   : > { %v736_v15 = vadd.f32 1.0, %v899_v14 }
 0x317   : > { %902 = vrcp.f32 %v736_v15 }
 0x320   : > { %v901_v16 = vpop.eup %900 }
 0x321   : > { %742 = vst.msk [vmem:[%s412_s16] sm:$0xff] %vm741_vm5, %v901_v16 }
 0x324   : > { %v903_v17 = vpop.eup %902 }
 0x325   : > { %743 = vst.msk [vmem:[%s412_s16 + $0x8] sm:$0xff] %vm741_vm5, %v903_v17 }
 0x326 PF: > { %s23_s19 = sadd.s32 1, %s910_s19  }
 0x327   : > { %p20_p4 = scmp.ge.s32.totalorder %s23_s19, 4  }
 0x329   :  { %22 = sbr.rel (!%p20_p4) target bundleno = 3 (0x3), region = 97 }

</bundles_post_ra>
